<compile_context>
chip_gen: v7x
topology: tpu7x:2x2x1
jax: 0.10.0
libtpu: 0.0.40
codegen_flags: <defaults>
</compile_context>

<pallas_src>
import numpy as np
import jax
import jax.numpy as jnp
from jax.experimental import pallas as pl
from jax.experimental.pallas import tpu as pltpu


# ----------------------------------------------------------------------------
# Color-space constants (identical to the PyTorch reference)
# ----------------------------------------------------------------------------
_LIN2XYZ = (
    (10135552 / 24577794, 8788810 / 24577794, 4435075 / 24577794),
    (2613072 / 12288897, 8788810 / 12288897, 887015 / 12288897),
    (1425312 / 73733382, 8788810 / 73733382, 70074185 / 73733382),
)
_XYZ2LIN = (
    (3.241003275, -1.537398934, -0.498615861),
    (-0.969224334, 1.875930071, 0.041554224),
    (0.055639423, -0.204011202, 1.057148933),
)
_REF_ILLUM = (0.950428545, 1.0, 1.088900371)
_INV_REF_ILLUM = (1.052156925, 1.0, 0.91835767)

# FLIP hyper-parameters (FLIPLoss.__init__)
_QC = 0.7
_QF = 0.5
_PC = 0.4
_PT = 0.95
_EPS = 1e-15
_PPD = 0.7 * 3840 / 0.7 * np.pi / 180

# Tile caps (elements); chosen so in+out blocks x2 (double buffering) stay
# well below v7x's 64 MiB VMEM (v5e/v6e have 128 MiB and more headroom).
_SPATIAL_TILE_CAP = 1 << 17   # flattened H*W tiles for elementwise kernels
_ROW_TILE_CAP = 128           # padded-row tiles for the horizontal conv pass
_COL_TILE_CAP = 128           # column tiles for the vertical conv pass


def _mat3(m, c0, c1, c2):
    return tuple(m[i][0] * c0 + m[i][1] * c1 + m[i][2] * c2 for i in range(3))


def _pow(x, p):
    # x is strictly positive at every call site.
    return jnp.exp(p * jnp.log(x))


def _tile_lane(n, cap):
    """Lane-axis tile size: full dim if it fits, else a multiple of 128."""
    if n <= cap:
        return n
    return max(128, (cap // 128) * 128)


def _tile_sublane(n, cap):
    """Sublane-axis tile size: full dim if it fits, else a multiple of 8."""
    if n <= cap:
        return n
    return max(8, (cap // 8) * 8)


def _cparams(n_grid_axes, block_bytes):
    # 2x for double buffering plus headroom; capped below v7x physical VMEM.
    limit = int(min(56 << 20, max(32 << 20, 2 * block_bytes + (4 << 20))))
    return pltpu.CompilerParams(
        dimension_semantics=("parallel",) * n_grid_axes,
        vmem_limit_bytes=limit,
    )


# ----------------------------------------------------------------------------
# Kernel 1: clamp + sRGB -> linRGB -> XYZ -> YCxCz  (lane-dense elementwise)
# ----------------------------------------------------------------------------
def _srgb2ycxcz_kernel(x_ref, o_ref):
    x = jnp.clip(x_ref[0], 0.0, 1.0)                       # (3, TS)
    limit = 0.04045
    lin = jnp.where(
        x > limit,
        _pow((jnp.maximum(x, limit) + 0.055) / 1.055, 2.4),
        x / 12.92,
    )
    X, Y, Z = _mat3(_LIN2XYZ, lin[0:1], lin[1:2], lin[2:3])
    X = X * _INV_REF_ILLUM[0]
    Y = Y * _INV_REF_ILLUM[1]
    Z = Z * _INV_REF_ILLUM[2]
    o_ref[0, 0:1] = 116.0 * Y - 16.0          # y
    o_ref[0, 1:2] = 500.0 * (X - Y)           # cx
    o_ref[0, 2:3] = 200.0 * (Y - Z)           # cz


def srgb_to_ycxcz(x):
    N, _, H, W = x.shape
    hw = H * W
    ts = _tile_lane(hw, _SPATIAL_TILE_CAP)
    blk = (1, 3, ts)
    out = pl.pallas_call(
        _srgb2ycxcz_kernel,
        out_shape=jax.ShapeDtypeStruct((N, 3, hw), jnp.float32),
        grid=(N, pl.cdiv(hw, ts)),
        in_specs=[pl.BlockSpec(blk, lambda n, s: (n, 0, s))],
        out_specs=pl.BlockSpec(blk, lambda n, s: (n, 0, s)),
        compiler_params=_cparams(2, 2 * 3 * ts * 4),
    )(x.reshape(N, 3, hw))
    return out.reshape(N, 3, H, W)


# ----------------------------------------------------------------------------
# Kernel 2: horizontal 1-D convolutions (separable filter terms), row-tiled.
#   Sources: padded YCxCz channels 0..2 and the normalized Y plane.
#   Weights are baked in as scalar constants (shifted multiply-add on the VPU).
# ----------------------------------------------------------------------------
def _make_conv_h_kernel(h_plan, W):
    def kernel(x_ref, o_ref):
        # x_ref: (1, 3, THp, Wp) padded YCxCz; o_ref: (1, T, THp, W)
        srcs = [x_ref[0, 0], x_ref[0, 1], x_ref[0, 2]]
        srcs.append((srcs[0] + 16.0) / 116.0)      # normalized achromatic Y
        for p, (src, v, off) in enumerate(h_plan):
            x = srcs[src]
            acc = v[0] * x[:, off:off + W]
            for k in range(1, len(v)):
                acc = acc + v[k] * x[:, off + k:off + k + W]
            o_ref[0, p] = acc
    return kernel


def conv_horizontal(img_pad, h_plan, W):
    N, _, Hp, Wp = img_pad.shape
    T = len(h_plan)
    thp = _tile_sublane(Hp, _ROW_TILE_CAP)
    in_blk = (1, 3, thp, Wp)
    out_blk = (1, T, thp, W)
    return pl.pallas_call(
        _make_conv_h_kernel(h_plan, W),
        out_shape=jax.ShapeDtypeStruct((N, T, Hp, W), jnp.float32),
        grid=(N, pl.cdiv(Hp, thp)),
        in_specs=[pl.BlockSpec(in_blk, lambda n, h: (n, 0, h, 0))],
        out_specs=pl.BlockSpec(out_blk, lambda n, h: (n, 0, h, 0)),
        compiler_params=_cparams(2, (3 * thp * Wp + T * thp * W) * 4),
    )(img_pad)


# ----------------------------------------------------------------------------
# Kernel 3: vertical 1-D convolutions, column-tiled, fused with the per-image
#   color tail (ycxcz->linRGB(clamp)->Lab->Hunt) and feature magnitudes.
#   Emits 5 channels: (L, 0.01*L*a, 0.01*L*b, |edge|, |point|).
# ----------------------------------------------------------------------------
def _make_conv_v_post_kernel(csf_vplans, feat_vplans, H):
    def kernel(p_ref, o_ref):
        # p_ref: (1, T, Hp, TW) horizontal partials; o_ref: (1, 5, H, TW)
        def vconv(plan):
            acc = None
            for (pi, u, off) in plan:
                x = p_ref[0, pi]                              # (Hp, TW)
                for k in range(len(u)):
                    term = u[k] * x[off + k:off + k + H, :]
                    acc = term if acc is None else acc + term
            return acc                                        # (H, TW)

        # --- color pipeline: CSF-filtered YCxCz -> Hunt-adjusted Lab --------
        fy = vconv(csf_vplans[0])
        fcx = vconv(csf_vplans[1])
        fcz = vconv(csf_vplans[2])
        y = (fy + 16.0) / 116.0
        cx = fcx / 500.0
        cz = fcz / 200.0
        X = (y + cx) * _REF_ILLUM[0]
        Y = y * _REF_ILLUM[1]
        Z = (y - cz) * _REF_ILLUM[2]
        r, g, b = _mat3(_XYZ2LIN, X, Y, Z)
        r = jnp.clip(r, 0.0, 1.0)
        g = jnp.clip(g, 0.0, 1.0)
        b = jnp.clip(b, 0.0, 1.0)
        X, Y, Z = _mat3(_LIN2XYZ, r, g, b)
        X = X * _INV_REF_ILLUM[0]
        Y = Y * _INV_REF_ILLUM[1]
        Z = Z * _INV_REF_ILLUM[2]
        delta = 6.0 / 29.0
        d3 = delta ** 3
        fac = 1.0 / (3.0 * delta * delta)

        def f(t):
            # TODO(synk): switch exp/log cube-root to a native cbrt if Mosaic grows one.
            return jnp.where(t > d3, _pow(jnp.maximum(t, d3), 1.0 / 3.0),
                             fac * t + 4.0 / 29.0)

        fX, fY, fZ = f(X), f(Y), f(Z)
        L = 116.0 * fY - 16.0
        a = 500.0 * (fX - fY)
        b2 = 200.0 * (fY - fZ)
        o_ref[0, 0] = L
        o_ref[0, 1] = 0.01 * L * a
        o_ref[0, 2] = 0.01 * L * b2

        # --- feature pipeline: edge / point magnitudes ----------------------
        ex = vconv(feat_vplans[0])
        ey = vconv(feat_vplans[1])
        px = vconv(feat_vplans[2])
        py = vconv(feat_vplans[3])
        o_ref[0, 3] = jnp.sqrt(ex * ex + ey * ey)
        o_ref[0, 4] = jnp.sqrt(px * px + py * py)
    return kernel


def conv_vertical_post(hpart, csf_vplans, feat_vplans, H, W):
    N, T, Hp, _ = hpart.shape
    tw = _tile_lane(W, _COL_TILE_CAP)
    in_blk = (1, T, Hp, tw)
    out_blk = (1, 5, H, tw)
    return pl.pallas_call(
        _make_conv_v_post_kernel(csf_vplans, feat_vplans, H),
        out_shape=jax.ShapeDtypeStruct((N, 5, H, W), jnp.float32),
        grid=(N, pl.cdiv(W, tw)),
        in_specs=[pl.BlockSpec(in_blk, lambda n, w: (n, 0, 0, w))],
        out_specs=pl.BlockSpec(out_blk, lambda n, w: (n, 0, 0, w)),
        compiler_params=_cparams(2, (T * Hp * tw + 5 * H * tw) * 4),
    )(hpart)


# ----------------------------------------------------------------------------
# Kernel 4: HyAB + error redistribution + feature-diff + final FLIP error map
#   (lane-dense flattened spatial tiles, ref and test as separate inputs)
# ----------------------------------------------------------------------------
def _make_error_kernel(cmax):
    pccmax = _PC * cmax
    scale_lo = _PT / pccmax
    scale_hi = (1.0 - _PT) / (cmax - pccmax)
    sqrt_eps = float(np.sqrt(_EPS))
    inv_sqrt2 = float(1.0 / np.sqrt(2.0))

    def kernel(pr_ref, pt_ref, o_ref):
        pr = pr_ref[0]                                   # (5, TS)
        pt = pt_ref[0]
        # HyAB on Hunt-adjusted Lab (channels 0..2); |dL| == sqrt(max(dL^2,eps))
        dL = pr[0:1] - pt[0:1]
        da = pr[1:2] - pt[1:2]
        db = pr[2:3] - pt[2:3]
        hyab = jnp.maximum(jnp.abs(dL), sqrt_eps) + jnp.sqrt(da * da + db * db)
        p = _pow(hyab, _QC)
        deltaE_c = jnp.where(p < pccmax, scale_lo * p, _PT + (p - pccmax) * scale_hi)
        # feature difference (channel 3 = edge magnitude, 4 = point magnitude)
        dEf = jnp.maximum(jnp.abs(pr[3:4] - pt[3:4]), jnp.abs(pt[4:5] - pr[4:5]))
        dEf = jnp.sqrt(jnp.maximum(dEf, _EPS) * inv_sqrt2)   # == (x/sqrt(2))**qf, qf=0.5
        o_ref[0] = jnp.exp((1.0 - dEf) * jnp.log(deltaE_c))
    return kernel


def error_map(pre_ref, pre_test, cmax):
    N, _, HW = pre_ref.shape
    ts = _tile_lane(HW, _SPATIAL_TILE_CAP)
    in_blk = (1, 5, ts)
    out_blk = (1, 1, ts)
    return pl.pallas_call(
        _make_error_kernel(cmax),
        out_shape=jax.ShapeDtypeStruct((N, 1, HW), jnp.float32),
        grid=(N, pl.cdiv(HW, ts)),
        in_specs=[pl.BlockSpec(in_blk, lambda n, s: (n, 0, s)),
                  pl.BlockSpec(in_blk, lambda n, s: (n, 0, s))],
        out_specs=pl.BlockSpec(out_blk, lambda n, s: (n, 0, s)),
        compiler_params=_cparams(2, (2 * 5 * ts + ts) * 4),
    )(pre_ref, pre_test)


# ----------------------------------------------------------------------------
# Deterministic filter construction + exact separable decomposition (host)
# ----------------------------------------------------------------------------
def _generate_spatial_filter_np(ppd, channel):
    a1_A, b1_A, a2_A, b2_A = 1, 0.0047, 0, 1e-5
    a1_rg, b1_rg, a2_rg, b2_rg = 1, 0.0053, 0, 1e-5
    a1_by, b1_by, a2_by, b2_by = 34.1, 0.04, 13.5, 0.025
    if channel == 'A':
        a1, b1, a2, b2 = a1_A, b1_A, a2_A, b2_A
    elif channel == 'RG':
        a1, b1, a2, b2 = a1_rg, b1_rg, a2_rg, b2_rg
    else:
        a1, b1, a2, b2 = a1_by, b1_by, a2_by, b2_by
    max_scale = max([b1_A, b2_A, b1_rg, b2_rg, b1_by, b2_by])
    r = int(np.ceil(3 * np.sqrt(max_scale / (2 * np.pi ** 2)) * ppd))
    deltaX = 1.0 / ppd
    x, y = np.meshgrid(range(-r, r + 1), range(-r, r + 1))
    z = (x * deltaX) ** 2 + (y * deltaX) ** 2
    g = (a1 * np.sqrt(np.pi / b1) * np.exp(-np.pi ** 2 * z / b1)
         + a2 * np.sqrt(np.pi / b2) * np.exp(-np.pi ** 2 * z / b2))
    g = g / np.sum(g)
    return g.astype(np.float64), r


def _feature_filter_np(ppd, feature_type):
    w = 0.082
    sd = 0.5 * w * ppd
    radius = int(np.ceil(3 * sd))
    x, y = np.meshgrid(range(-radius, radius + 1), range(-radius, radius + 1))
    g = np.exp(-(x ** 2 + y ** 2) / (2 * sd * sd))
    if feature_type == 'edge':
        Gx = np.multiply(-x, g)
    else:
        Gx = np.multiply(x ** 2 / (sd * sd) - 1, g)
    negsum = -np.sum(Gx[Gx < 0])
    possum = np.sum(Gx[Gx > 0])
    Gx = np.where(Gx < 0, Gx / negsum, Gx / possum)
    return Gx.astype(np.float64), radius


def _separable_terms(f2d, rel_tol=1e-7):
    """Exact (rank<=2) separable decomposition: f2d == sum_i outer(u_i, v_i)."""
    f = np.asarray(f2d, np.float64)
    U, S, Vt = np.linalg.svd(f)
    terms = []
    for i, s in enumerate(S):
        if s > rel_tol * S[0]:
            u = U[:, i] * s
            v = Vt[i, :]
            terms.append((tuple(float(t) for t in u), tuple(float(t) for t in v)))
    recon = sum(np.outer(np.asarray(u), np.asarray(v)) for (u, v) in terms)
    assert np.max(np.abs(recon - f)) < 1e-9, "separable decomposition failed"
    return terms


def _build_conv_plans(ppd):
    s_a, r_csf = _generate_spatial_filter_np(ppd, 'A')
    s_rg, _ = _generate_spatial_filter_np(ppd, 'RG')
    s_by, _ = _generate_spatial_filter_np(ppd, 'BY')
    edge_g, r_feat = _feature_filter_np(ppd, 'edge')
    point_g, _ = _feature_filter_np(ppd, 'point')
    r = max(r_csf, r_feat)

    # h_plan entries: (source plane [0..2 = YCxCz, 3 = normalized Y], v profile, col offset)
    # v-plans entries: (partial-plane index, u profile, row offset)
    h_plan = []
    csf_vplans = []   # one per CSF channel (A, RG, BY)
    feat_vplans = []  # one per feature map (edgeX, edgeY, pointX, pointY)
    plane = 0
    for c, f2d in enumerate((s_a, s_rg, s_by)):
        vplan = []
        for (u, v) in _separable_terms(f2d):
            h_plan.append((c, v, r - r_csf))
            vplan.append((plane, u, r - r_csf))
            plane += 1
        csf_vplans.append(vplan)
    for f2d in (edge_g, edge_g.T, point_g, point_g.T):
        vplan = []
        for (u, v) in _separable_terms(f2d):
            h_plan.append((3, v, r - r_feat))
            vplan.append((plane, u, r - r_feat))
            plane += 1
        feat_vplans.append(vplan)
    return h_plan, csf_vplans, feat_vplans, r


def _lab_hunt_np(rgb):
    rgb = np.asarray(rgb, np.float64)
    A = np.array(_LIN2XYZ, np.float64)
    xyz = A @ rgb
    xyz = xyz * np.array(_INV_REF_ILLUM, np.float64)
    delta = 6 / 29
    d3 = delta ** 3
    f = np.where(xyz > d3, np.maximum(xyz, d3) ** (1 / 3), xyz / (3 * delta * delta) + 4 / 29)
    L = 116 * f[1] - 16
    a = 500 * (f[0] - f[1])
    b = 200 * (f[1] - f[2])
    return np.array([L, 0.01 * L * a, 0.01 * L * b])


def _compute_cmax():
    gr = _lab_hunt_np([0.0, 1.0, 0.0])
    bl = _lab_hunt_np([0.0, 0.0, 1.0])
    d = gr - bl
    hy = np.sqrt(max(d[0] ** 2, _EPS)) + np.sqrt(d[1] ** 2 + d[2] ** 2)
    return float(hy ** _QC)


# ----------------------------------------------------------------------------
# FLIP loss forward
# ----------------------------------------------------------------------------
def flip_loss(test, reference, pixels_per_degree=_PPD):
    test = test.astype(jnp.float32)
    reference = reference.astype(jnp.float32)
    N, C, H, W = test.shape
    assert C == 3, "FLIP requires RGB input"

    h_plan, csf_vplans, feat_vplans, r = _build_conv_plans(pixels_per_degree)
    cmax = _compute_cmax()

    def preprocess(img):
        opp = srgb_to_ycxcz(img)                                           # (N,3,H,W)
        opp_pad = jnp.pad(opp, ((0, 0), (0, 0), (r, r), (r, r)), mode='edge')
        hpart = conv_horizontal(opp_pad, h_plan, W)                        # (N,T,Hp,W)
        pre = conv_vertical_post(hpart, csf_vplans, feat_vplans, H, W)     # (N,5,H,W)
        return pre.reshape(N, 5, H * W)

    pre_r = preprocess(reference)
    pre_t = preprocess(test)
    deltaE = error_map(pre_r, pre_t, cmax)                                 # (N,1,H*W)

    # final scalar mean (tiny reduction, plain JAX glue)
    return jnp.mean(deltaE)


if __name__ == "__main__":
    key = jax.random.PRNGKey(0)
    k1, k2 = jax.random.split(key)
    N, C, H, W = 2, 3, 16, 16
    test_img = jax.random.uniform(k1, (N, C, H, W), dtype=jnp.float32)
    ref_img = jax.random.uniform(k2, (N, C, H, W), dtype=jnp.float32)

    loss = flip_loss(test_img, ref_img)
    jax.block_until_ready(loss)
    assert loss.shape == () and bool(jnp.isfinite(loss))
    print("KERNEL_OK")
</pallas_src>

<mosaic_0001>
module attributes {stable_mosaic.version = 11 : i64} {
  func.func @_srgb2ycxcz_kernel(%arg0: i32, %arg1: i32, %arg2: memref<1x3x256xf32, #tpu.memory_space<vmem>>, %arg3: memref<1x3x256xf32, #tpu.memory_space<vmem>>) attributes {dimension_semantics = [#tpu.dimension_semantics<parallel>, #tpu.dimension_semantics<parallel>], iteration_bounds = array<i64: 2, 1>, scalar_prefetch = 0 : i64, scratch_operands = 0 : i64, tpu.core_type = #tpu.core_type<tc>, window_params = [{transform_indices = @transform_0, window_bounds = array<i64: 1, 3, 256>}, {transform_indices = @transform_1, window_bounds = array<i64: 1, 3, 256>}]} {
    %c0 = arith.constant 0 : index
    %c0_0 = arith.constant 0 : index
    %c0_1 = arith.constant 0 : index
    %0 = vector.load %arg2[%c0, %c0_0, %c0_1] : memref<1x3x256xf32, #tpu.memory_space<vmem>>, vector<1x3x256xf32>
    %1 = vector.shape_cast %0 : vector<1x3x256xf32> to vector<3x256xf32>
    %cst = arith.constant 0.000000e+00 : f32
    %cst_2 = arith.constant 1.000000e+00 : f32
    %2 = vector.broadcast %cst : f32 to vector<3x256xf32>
    %3 = arith.maximumf %2, %1 : vector<3x256xf32>
    %4 = vector.broadcast %cst_2 : f32 to vector<3x256xf32>
    %5 = arith.minimumf %4, %3 : vector<3x256xf32>
    %cst_3 = arith.constant 4.045000e-02 : f32
    %6 = vector.broadcast %cst_3 : f32 to vector<3x256xf32>
    %7 = arith.cmpf ogt, %5, %6 : vector<3x256xf32>
    %cst_4 = arith.constant 4.045000e-02 : f32
    %8 = vector.broadcast %cst_4 : f32 to vector<3x256xf32>
    %9 = arith.maximumf %5, %8 : vector<3x256xf32>
    %cst_5 = arith.constant 5.500000e-02 : f32
    %10 = vector.broadcast %cst_5 : f32 to vector<3x256xf32>
    %11 = arith.addf %9, %10 : vector<3x256xf32>
    %cst_6 = arith.constant 1.055000e+00 : f32
    %12 = vector.broadcast %cst_6 : f32 to vector<3x256xf32>
    %13 = arith.divf %11, %12 : vector<3x256xf32>
    %14 = math.log %13 : vector<3x256xf32>
    %cst_7 = arith.constant 2.400000e+00 : f32
    %15 = vector.broadcast %cst_7 : f32 to vector<3x256xf32>
    %16 = arith.mulf %15, %14 : vector<3x256xf32>
    %17 = math.exp %16 : vector<3x256xf32>
    %cst_8 = arith.constant 1.292000e+01 : f32
    %18 = vector.broadcast %cst_8 : f32 to vector<3x256xf32>
    %19 = arith.divf %5, %18 : vector<3x256xf32>
    %20 = arith.select %7, %17, %19 : vector<3x256xi1>, vector<3x256xf32>
    %21 = vector.extract_strided_slice %20 {offsets = [0, 0], sizes = [1, 256], strides = [1, 1]} : vector<3x256xf32> to vector<1x256xf32>
    %22 = vector.extract_strided_slice %20 {offsets = [1, 0], sizes = [1, 256], strides = [1, 1]} : vector<3x256xf32> to vector<1x256xf32>
    %23 = vector.extract_strided_slice %20 {offsets = [2, 0], sizes = [1, 256], strides = [1, 1]} : vector<3x256xf32> to vector<1x256xf32>
    %cst_9 = arith.constant 0.412386566 : f32
    %24 = vector.broadcast %cst_9 : f32 to vector<1x256xf32>
    %25 = arith.mulf %24, %21 : vector<1x256xf32>
    %cst_10 = arith.constant 0.35759148 : f32
    %26 = vector.broadcast %cst_10 : f32 to vector<1x256xf32>
    %27 = arith.mulf %26, %22 : vector<1x256xf32>
    %28 = arith.addf %25, %27 : vector<1x256xf32>
    %cst_11 = arith.constant 0.180450484 : f32
    %29 = vector.broadcast %cst_11 : f32 to vector<1x256xf32>
    %30 = arith.mulf %29, %23 : vector<1x256xf32>
    %31 = arith.addf %28, %30 : vector<1x256xf32>
    %cst_12 = arith.constant 0.212636828 : f32
    %32 = vector.broadcast %cst_12 : f32 to vector<1x256xf32>
    %33 = arith.mulf %32, %21 : vector<1x256xf32>
    %cst_13 = arith.constant 0.71518296 : f32
    %34 = vector.broadcast %cst_13 : f32 to vector<1x256xf32>
    %35 = arith.mulf %34, %22 : vector<1x256xf32>
    %36 = arith.addf %33, %35 : vector<1x256xf32>
    %cst_14 = arith.constant 7.218020e-02 : f32
    %37 = vector.broadcast %cst_14 : f32 to vector<1x256xf32>
    %38 = arith.mulf %37, %23 : vector<1x256xf32>
    %39 = arith.addf %36, %38 : vector<1x256xf32>
    %cst_15 = arith.constant 0.0193306208 : f32
    %40 = vector.broadcast %cst_15 : f32 to vector<1x256xf32>
    %41 = arith.mulf %40, %21 : vector<1x256xf32>
    %cst_16 = arith.constant 0.11919716 : f32
    %42 = vector.broadcast %cst_16 : f32 to vector<1x256xf32>
    %43 = arith.mulf %42, %22 : vector<1x256xf32>
    %44 = arith.addf %41, %43 : vector<1x256xf32>
    %cst_17 = arith.constant 0.950372576 : f32
    %45 = vector.broadcast %cst_17 : f32 to vector<1x256xf32>
    %46 = arith.mulf %45, %23 : vector<1x256xf32>
    %47 = arith.addf %44, %46 : vector<1x256xf32>
    %cst_18 = arith.constant 1.05215693 : f32
    %48 = vector.broadcast %cst_18 : f32 to vector<1x256xf32>
    %49 = arith.mulf %31, %48 : vector<1x256xf32>
    %cst_19 = arith.constant 1.000000e+00 : f32
    %50 = vector.broadcast %cst_19 : f32 to vector<1x256xf32>
    %51 = arith.mulf %39, %50 : vector<1x256xf32>
    %cst_20 = arith.constant 0.91835767 : f32
    %52 = vector.broadcast %cst_20 : f32 to vector<1x256xf32>
    %53 = arith.mulf %47, %52 : vector<1x256xf32>
    %cst_21 = arith.constant 1.160000e+02 : f32
    %54 = vector.broadcast %cst_21 : f32 to vector<1x256xf32>
    %55 = arith.mulf %54, %51 : vector<1x256xf32>
    %cst_22 = arith.constant 1.600000e+01 : f32
    %56 = vector.broadcast %cst_22 : f32 to vector<1x256xf32>
    %57 = arith.subf %55, %56 : vector<1x256xf32>
    %c0_23 = arith.constant 0 : index
    %c0_24 = arith.constant 0 : index
    %c0_25 = arith.constant 0 : index
    %58 = vector.load %arg3[%c0_23, %c0_24, %c0_25] : memref<1x3x256xf32, #tpu.memory_space<vmem>>, vector<1x1x256xf32>
    %59 = vector.shape_cast %58 : vector<1x1x256xf32> to vector<1x256xf32>
    %60 = vector.shape_cast %57 : vector<1x256xf32> to vector<1x1x256xf32>
    tpu.vector_store %arg3[%c0_23, %c0_24, %c0_25], %60 {strides = array<i32>} : memref<1x3x256xf32, #tpu.memory_space<vmem>>, vector<1x1x256xf32>,
    %61 = arith.subf %49, %51 : vector<1x256xf32>
    %cst_26 = arith.constant 5.000000e+02 : f32
    %62 = vector.broadcast %cst_26 : f32 to vector<1x256xf32>
    %63 = arith.mulf %62, %61 : vector<1x256xf32>
    %c0_27 = arith.constant 0 : index
    %c1 = arith.constant 1 : index
    %c0_28 = arith.constant 0 : index
    %64 = vector.load %arg3[%c0_27, %c1, %c0_28] : memref<1x3x256xf32, #tpu.memory_space<vmem>>, vector<1x1x256xf32>
    %65 = vector.shape_cast %64 : vector<1x1x256xf32> to vector<1x256xf32>
    %66 = vector.shape_cast %63 : vector<1x256xf32> to vector<1x1x256xf32>
    tpu.vector_store %arg3[%c0_27, %c1, %c0_28], %66 {strides = array<i32>} : memref<1x3x256xf32, #tpu.memory_space<vmem>>, vector<1x1x256xf32>,
    %67 = arith.subf %51, %53 : vector<1x256xf32>
    %cst_29 = arith.constant 2.000000e+02 : f32
    %68 = vector.broadcast %cst_29 : f32 to vector<1x256xf32>
    %69 = arith.mulf %68, %67 : vector<1x256xf32>
    %c0_30 = arith.constant 0 : index
    %c2 = arith.constant 2 : index
    %c0_31 = arith.constant 0 : index
    %70 = vector.load %arg3[%c0_30, %c2, %c0_31] : memref<1x3x256xf32, #tpu.memory_space<vmem>>, vector<1x1x256xf32>
    %71 = vector.shape_cast %70 : vector<1x1x256xf32> to vector<1x256xf32>
    %72 = vector.shape_cast %69 : vector<1x256xf32> to vector<1x1x256xf32>
    tpu.vector_store %arg3[%c0_30, %c2, %c0_31], %72 {strides = array<i32>} : memref<1x3x256xf32, #tpu.memory_space<vmem>>, vector<1x1x256xf32>,
    return
  }
  func.func @transform_0(%arg0: i32, %arg1: i32) -> (i32, i32, i32) {
    %c0_i32 = arith.constant 0 : i32
    %c0_i32_0 = arith.constant 0 : i32
    return %arg0, %c0_i32, %arg1 : i32, i32, i32
  }
  func.func @transform_1(%arg0: i32, %arg1: i32) -> (i32, i32, i32) {
    %c0_i32 = arith.constant 0 : i32
    %c0_i32_0 = arith.constant 0 : i32
    return %arg0, %c0_i32, %arg1 : i32, i32, i32
  }
}

</mosaic_0001>

<bundles_post_ra>
// kernel: tpu_custom_call.1
= control target key start
LH: loop header
LB: loop body
LE: loop exit
PB: predicated region body
PF: predicated region fallthrough
CT: control target
= control target key end

     0   :  { %s449_s6 = smov 0   ;;  %s451_s7 = smov 0   ;;  %s489_s0 = inlined_call_operand.vmem [shape: f32[2,3,256], index: 0, kind: input, shape index: {}]   ;;  %s490_s1 = inlined_call_operand.vmem [shape: f32[2,3,256], index: 1, kind: output, shape index: {}]  }
   0x1   :  { %s453_s8 = smov 0  }
   0x2 LB: > { %s23_s9 = sadd.s32 1, %s432_s7  ;;  %p367_p0 = scmp.ge.s32.totalorder %s436_s8, 1  ;;  %s436_s8 = sphi %s453_s8, %s11_s8   ;;  %s432_s7 = sphi %s451_s7, %s492_s7   ;;  %s428_s6 = sphi %s449_s6, %s491_s6  }
   0x3   : > { %p25_p1 = scmp.ge.s32.totalorder %s23_s9, 2  ;;  %p108_p2 = scmp.lt.s32.totalorder %s436_s8, 3 }
   0x5   : > { %s494_s9 = smov (%p25_p1, %s23_s9), 0  ;;  %p109_p3 = pnand %p367_p0, %p108_p2 }
   0x6   : > { %p137_p4 = scmp.lt.s32.totalorder (!%p109_p3), %s428_s6, 1  ;;  %v219_v13 = vlaneseq (!%p109_p3)  ;;  %v438_v17 = vmov (!%p109_p3), 1966171168  }
   0x7   : > { %112 = sbr.rel (%p109_p3) target bundleno = 78 (0x4e), region = 24  ;;  %v217_v18 = vunpack.c.l.s4 (!%p109_p3), %v438_v17 }
   0x8   : > { %v220_v31 = vshrl.u32 (!%p109_p3), %v219_v13, 7  ;;  %vm233_vm1 = vcmp.lt.s32.totalorder (!%p109_p3), %v219_v13, 256 }
   0x9   : > { %v218_v30 = vunpack.c.0.s8 (!%p109_p3), %v217_v18 }
   0xb   : > { %v221_v39 = vsub.s32 (!%p109_p3), %v218_v30, %v220_v31 }
   0xe   : > { %s496_s6 = smov (!%p137_p4, %s428_s6), 1 }
   0xf   : > { %s383_s10 = sshll.u32 %s496_s6, 3 }
  0x10   : > { %s144_s13 = scalar_lea.vmem %s489_s0, %s383_s10  ;;  %s154_s16 = scalar_lea.vmem %s490_s1, %s383_s10 }
  0x11   : > { %v156_v0 = vld [vmem:[%s144_s13] sm:$0x77] }
  0x12   : > { %v157_v1 = vmax.f32 %v156_v0, 0.0 }
  0x14   : > { %v158_v2 = vmin.f32 %v157_v1, 1.0 }
  0x16   : > { %v160_v3 = vmax.f32 %v158_v2, 0.04045  ;;  %v170_v10 = vmul.f32 0.07739938, %v158_v2  ;;  %vm159_vm0 = vcmp.gt.f32.partialorder %v158_v2, 0.04045 }
  0x18   : > { %v161_v4 = vadd.f32 0.055, %v160_v3 }
  0x1a   : > { %v163_v5 = vmul.f32 0.94786733, %v161_v4 }
  0x1c   : > { %410 = vlog2.f32 %v163_v5 }
  0x26   : > { %v411_v6 = vpop.eup %410 }
  0x27   : > { %v165_v7 = vmul.f32 0.6931472, %v411_v6 }
  0x29   : > { %v166_v8 = vmul.f32 2.4, %v165_v7 }
  0x2b   : > { %v167_v9 = vmul.f32 1.442695, %v166_v8 }
  0x2d   : > { %412 = vpow2.f32 %v167_v9 }
  0x37   : > { %v413_v11 = vpop.eup %412 }
  0x38   : > { %v171_v12 = vsel %vm159_vm0, %v413_v11, %v170_v10 }
  0x39   : > { %v185_v14 = vmul.f32 0.21263683, %v171_v12  ;;  %v186_v15 = vmul.f32 0.71518296, %v171_v12  ;;  %v192_v16 = vmul.f32 0.0721802, %v171_v12 }
  0x3a   : > { %v172_v19 = vmul.f32 0.41238657, %v171_v12  ;;  %v173_v20 = vmul.f32 0.35759148, %v171_v12  ;;  %v179_v21 = vmul.f32 0.18045048, %v171_v12 }
  0x3b   : > { %v374_v22 = vrot.slane %v186_v15, 9  ;;  %v375_v23 = vrot.slane %v192_v16, 10  ;;  %v198_v24 = vmul.f32 0.01933062, %v171_v12  ;;  %v199_v25 = vmul.f32 0.11919716, %v171_v12 }
  0x3c   : > { %v372_v26 = vrot.slane %v173_v20, 9  ;;  %v373_v27 = vrot.slane %v179_v21, 10  ;;  %v205_v28 = vmul.f32 0.9503726, %v171_v12 }
  0x3d   : > { %v191_v29 = vadd.f32 %v374_v22, %v185_v14  ;;  %v376_v32 = vrot.slane %v199_v25, 9 }
  0x3e   : > { %v178_v33 = vadd.f32 %v372_v26, %v172_v19  ;;  %v377_v34 = vrot.slane %v205_v28, 10 }
  0x3f   : > { %v197_v35 = vadd.f32 %v375_v23, %v191_v29  ;;  %v204_v36 = vadd.f32 %v376_v32, %v198_v24 }
  0x40   : > { %v184_v37 = vadd.f32 %v373_v27, %v178_v33 }
  0x41   : > { %v213_v38 = vmul.f32 116.0, %v197_v35  ;;  %v210_v40 = vadd.f32 %v377_v34, %v204_v36 }
  0x42   : > { %v211_v41 = vmul.f32 1.0521569, %v184_v37 }
  0x43   : > { %v378_v42 = vadd.f32 -16.0, %v213_v38  ;;  %v212_v43 = vmul.f32 0.9183577, %v210_v40 }
  0x44   : > { %v236_v44 = vsub.f32 %v211_v41, %v197_v35 }
  0x45   : > { %v222_v45 = vrot.slane %v378_v42, %v221_v39  ;;  %v256_v46 = vsub.f32 %v197_v35, %v212_v43 }
  0x46   : > { %v237_v47 = vmul.f32 500.0, %v236_v44 }
  0x47   : > { %v229_v48 = vrot.slane %v222_v45, %v221_v39  ;;  %v257_v49 = vmul.f32 200.0, %v256_v46 }
  0x48   : > { %v245_v50 = vrot.slane %v237_v47, %v221_v39 }
  0x49   : > { %235 = vst.msk [vmem:[%s154_s16] ss:$4 sm:$0x3] %vm233_vm1, %v229_v48  ;;  %v265_v51 = vrot.slane %v257_v49, %v221_v39 }
  0x4a   : > { %v252_v52 = vrot.slane %v245_v50, %v221_v39 }
  0x4b   : > { %v272_v53 = vrot.slane %v265_v51, %v221_v39 }
  0x4c   : > { %379 = vst.msk [vmem:[%s154_s16 + $0x1] ss:$4 sm:$0x3] %vm233_vm1, %v252_v52 }
  0x4d   : > { %380 = vst.msk [vmem:[%s154_s16 + $0x2] ss:$4 sm:$0x3] %vm233_vm1, %v272_v53 }
  0x4e PF: > { %s11_s8 = sadd.s32 1, %s436_s8   ;;  %s491_s6 = smov %s432_s7 }
  0x4f   : > { %p8_p5 = scmp.ge.s32.totalorder %s11_s8, 4   ;;  %s492_s7 = smov %s494_s9 }
  0x51   :  { %10 = sbr.rel (!%p8_p5) target bundleno = 2 (0x2), region = 56 }

</bundles_post_ra>
